<compile_context>
chip_gen: v5e
topology: v5e:2x2
jax: 0.10.0
libtpu: 0.0.40
codegen_flags: <defaults>
</compile_context>

<pallas_src>
import functools

import jax
import jax.numpy as jnp
from jax.experimental import pallas as pl
from jax.experimental.pallas import tpu as pltpu


# ---------------------------------------------------------------------------
# Single-pass kernels (pool + MLP + scale, block fully resident in VMEM)
# ---------------------------------------------------------------------------

def _se_kernel_channels_first(x_ref, w1t_ref, b1_ref, w2t_ref, b2_ref, o_ref):
    """x_ref/o_ref: (TB, C, HW) -- lane dim = HW."""
    x = x_ref[...]
    inv_hw = 1.0 / x.shape[-1]
    # AdaptiveAvgPool2d(1): f32 accumulation only (no f32 copy of the block).
    pooled = jnp.sum(x, axis=-1, dtype=jnp.float32) * inv_hw            # (TB, C)
    # fc[0]: Linear(C -> C//r) + ReLU (weights pre-transposed in the wrapper).
    h = jnp.dot(pooled, w1t_ref[...], preferred_element_type=jnp.float32)
    h = jnp.maximum(h + b1_ref[...], 0.0)                               # (TB, Ch)
    # fc[2]: Linear(C//r -> C) + Sigmoid.
    y = jnp.dot(h, w2t_ref[...], preferred_element_type=jnp.float32)
    y = jax.nn.sigmoid(y + b2_ref[...])                                 # (TB, C)
    # x * y.expand_as(x): fused multiply-store in the input dtype.
    # (For bf16 inputs this rounds the gate once to bf16 before the multiply.)
    o_ref[...] = (x * y.astype(x.dtype)[:, :, None]).astype(o_ref.dtype)


def _se_kernel_channels_last(x_ref, w1t_ref, b1_ref, w2t_ref, b2_ref, o_ref):
    """x_ref/o_ref: (TB, HW, C) -- lane dim = C (dense when C % 128 == 0)."""
    x = x_ref[...]
    inv_hw = 1.0 / x.shape[1]
    pooled = jnp.sum(x, axis=1, dtype=jnp.float32) * inv_hw             # (TB, C)
    h = jnp.dot(pooled, w1t_ref[...], preferred_element_type=jnp.float32)
    h = jnp.maximum(h + b1_ref[...], 0.0)
    y = jnp.dot(h, w2t_ref[...], preferred_element_type=jnp.float32)
    y = jax.nn.sigmoid(y + b2_ref[...])                                 # (TB, C)
    o_ref[...] = (x * y.astype(x.dtype)[:, None, :]).astype(o_ref.dtype)


# ---------------------------------------------------------------------------
# Spatial-split fallback (one image does not fit the single-pass block):
#   pass 1: pooled mean accumulated over an inner "arbitrary" HW axis, with
#           the SE MLP fused into the last HW step -> gate y of shape (B, C, 1)
#   pass 2: out = x * y                               (3N HBM traffic total)
# ---------------------------------------------------------------------------

def _se_pool_mlp_kernel(x_ref, w1t_ref, b1_ref, w2t_ref, b2_ref, y_ref, *,
                        total_hw):
    """x_ref: (1, C, THW); y_ref: (1, C, 1) f32, resident across the HW axis."""
    hw_i = pl.program_id(1)

    @pl.when(hw_i == 0)
    def _init():
        y_ref[...] = jnp.zeros_like(y_ref)

    x = x_ref[...]
    thw = x.shape[-1]
    if total_hw % thw != 0:
        # Ragged last spatial tile: zero out-of-range lanes before accumulating.
        pos = hw_i * thw + jax.lax.broadcasted_iota(jnp.int32, x.shape, 2)
        x = jnp.where(pos < total_hw, x, jnp.zeros_like(x))
    y_ref[...] += jnp.sum(x, axis=-1, keepdims=True, dtype=jnp.float32)

    @pl.when(hw_i == pl.num_programs(1) - 1)
    def _finalize():
        pooled = y_ref[...][:, :, 0] * (1.0 / total_hw)                 # (1, C)
        h = jnp.dot(pooled, w1t_ref[...], preferred_element_type=jnp.float32)
        h = jnp.maximum(h + b1_ref[...], 0.0)
        y = jnp.dot(h, w2t_ref[...], preferred_element_type=jnp.float32)
        y_ref[...] = jax.nn.sigmoid(y + b2_ref[...])[:, :, None]


def _se_scale_kernel(x_ref, y_ref, o_ref):
    """x_ref/o_ref: (1, C, THW); y_ref: (1, C, 1) f32 gate."""
    x = x_ref[...]
    o_ref[...] = (x * y_ref[...].astype(x.dtype)).astype(o_ref.dtype)


# ---------------------------------------------------------------------------
# Tiling / budget helpers
# ---------------------------------------------------------------------------

def _round_up(n, m):
    return (n + m - 1) // m * m


def _tpu_vmem_params():
    """Generation-aware (vmem_target_bytes, vmem_cap_bytes, min_grid_steps)."""
    try:
        cap = int(pltpu.get_tpu_info().vmem_capacity_bytes)
    except Exception:          # unknown chip / interpreter: assume the smallest
        cap = 64 << 20
    if cap > (96 << 20):       # v5e / v6e class: 128 MiB physical VMEM
        return 56 << 20, 96 << 20, 2
    # v7x class: 64 MiB per TensorCore, 2 TCs -> want >= 2 steps per core so
    # the VPU reduce + vst-bound scale pass pipelines under the ~3.2 TB/s DMA.
    return 24 << 20, 48 << 20, 4


def _choose_batch_tile(B, padded_image_bytes, vmem_target_bytes, min_steps):
    # in + out blocks, double-buffered -> ~4 * TB * padded_image_bytes of VMEM.
    tb = int(max(1, vmem_target_bytes // max(1, 4 * padded_image_bytes)))
    tb = min(tb, B)
    # Keep enough grid steps for cross-iteration pipelining when B allows; the
    # last block may be ragged (grid uses cdiv), which is safe here.
    target_steps = min(min_steps, B)
    tb = min(tb, pl.cdiv(B, target_steps))
    return max(1, tb)


def _channel_attention_spatial_split(x_flat, w1t, b1_2d, w2t, b2_2d, *,
                                     vmem_target, vmem_cap, weight_bytes,
                                     forced_tile, donate_x):
    B, C, HW = x_flat.shape
    hidden = w1t.shape[1]
    dtype_bytes = jnp.dtype(x_flat.dtype).itemsize
    c_pad = _round_up(C, 8)

    if forced_tile is not None:
        thw = int(forced_tile)
    else:
        thw = int(vmem_target // max(1, 4 * c_pad * dtype_bytes))
    if thw >= HW:
        thw = HW
    else:
        thw = max(128, (thw // 128) * 128)     # keep the lane dim 128-dense
    n_hw = pl.cdiv(HW, thw)

    block_bytes = c_pad * _round_up(thw, 128) * dtype_bytes
    vmem_pool = int(min(max(2 * block_bytes + 2 * weight_bytes + (4 << 20),
                            16 << 20), vmem_cap))
    vmem_scale = int(min(max(4 * block_bytes + (4 << 20), 16 << 20), vmem_cap))

    # Pass 1: pooled mean over the inner ("arbitrary") HW axis + SE MLP.
    y = pl.pallas_call(
        functools.partial(_se_pool_mlp_kernel, total_hw=HW),
        out_shape=jax.ShapeDtypeStruct((B, C, 1), jnp.float32),
        grid_spec=pltpu.PrefetchScalarGridSpec(
            num_scalar_prefetch=0,
            grid=(B, n_hw),
            in_specs=[
                pl.BlockSpec((1, C, thw), lambda b, s: (b, 0, s)),
                pl.BlockSpec((C, hidden), lambda b, s: (0, 0)),
                pl.BlockSpec((1, hidden), lambda b, s: (0, 0)),
                pl.BlockSpec((hidden, C), lambda b, s: (0, 0)),
                pl.BlockSpec((1, C), lambda b, s: (0, 0)),
            ],
            out_specs=pl.BlockSpec((1, C, 1), lambda b, s: (b, 0, 0)),
        ),
        compiler_params=pltpu.CompilerParams(
            dimension_semantics=("parallel", "arbitrary"),
            vmem_limit_bytes=vmem_pool,
        ),
        cost_estimate=pl.CostEstimate(
            flops=B * C * HW + 4 * B * C * hidden,
            transcendentals=B * C,
            bytes_accessed=B * C * HW * dtype_bytes + B * C * 4,
        ),
    )(x_flat, w1t, b1_2d, w2t, b2_2d)

    # Pass 2: out = x * y (broadcast along HW).
    out = pl.pallas_call(
        _se_scale_kernel,
        out_shape=jax.ShapeDtypeStruct((B, C, HW), x_flat.dtype),
        grid_spec=pltpu.PrefetchScalarGridSpec(
            num_scalar_prefetch=0,
            grid=(B, n_hw),
            in_specs=[
                pl.BlockSpec((1, C, thw), lambda b, s: (b, 0, s)),
                pl.BlockSpec((1, C, 1), lambda b, s: (b, 0, 0)),
            ],
            out_specs=pl.BlockSpec((1, C, thw), lambda b, s: (b, 0, s)),
        ),
        compiler_params=pltpu.CompilerParams(
            dimension_semantics=("parallel", "parallel"),
            vmem_limit_bytes=vmem_scale,
        ),
        cost_estimate=pl.CostEstimate(
            flops=B * C * HW,
            transcendentals=0,
            bytes_accessed=2 * B * C * HW * dtype_bytes,
        ),
        input_output_aliases=({0: 0} if donate_x else {}),
    )(x_flat, y)
    return out


# ---------------------------------------------------------------------------
# Public wrapper
# ---------------------------------------------------------------------------

@functools.partial(jax.jit, static_argnames=("donate_x", "spatial_split_tile"))
def channel_attention(x, w1, b1, w2, b2, *, donate_x=False,
                      spatial_split_tile=None):
    """out = x * sigmoid(W2 @ relu(W1 @ mean_{H,W}(x) + b1) + b2), NCHW input.

    donate_x: alias x's buffer to the output (only if the caller donates x).
    spatial_split_tile: force the two-pass spatial-split path with this HW
      tile (escape hatch / testing); otherwise selected automatically when a
      single image does not fit the VMEM budget.
    """
    B, C, H, W = x.shape
    HW = H * W
    hidden = w1.shape[0]
    dtype_bytes = jnp.dtype(x.dtype).itemsize

    # Hoist the weight transposes out of the kernel (loop-invariant).
    w1t = w1.T                                    # (C, hidden)
    w2t = w2.T                                    # (hidden, C)
    b1_2d = b1.reshape(1, hidden)
    b2_2d = b2.reshape(1, C)
    weight_bytes = sum(int(a.size) * jnp.dtype(a.dtype).itemsize
                       for a in (w1t, w2t, b1_2d, b2_2d))

    vmem_target, vmem_cap, min_steps = _tpu_vmem_params()

    # Lane-density-aware block layout: prefer a minor dim that's a multiple of
    # 128 (unmasked stores, dense DMA).  Typical SE spatial sizes (7x7, 14x14)
    # are not; SE channel counts often are.
    channels_last = (HW % 128 != 0) and (C % 128 == 0)
    if channels_last:
        padded_image_bytes = _round_up(HW, 8) * _round_up(C, 128) * dtype_bytes
    else:
        padded_image_bytes = _round_up(C, 8) * _round_up(HW, 128) * dtype_bytes

    single_pass_fits = (
        4 * padded_image_bytes + 2 * weight_bytes + (4 << 20) <= vmem_cap)

    if spatial_split_tile is not None or not single_pass_fits:
        out_flat = _channel_attention_spatial_split(
            x.reshape(B, C, HW), w1t, b1_2d, w2t, b2_2d,
            vmem_target=vmem_target, vmem_cap=vmem_cap,
            weight_bytes=weight_bytes, forced_tile=spatial_split_tile,
            donate_x=donate_x)
        return out_flat.reshape(B, C, H, W)

    tb = _choose_batch_tile(B, padded_image_bytes, vmem_target, min_steps)
    grid = (pl.cdiv(B, tb),)          # ragged tail OK: per-image independence

    if channels_last:
        # Wrapper-side layout plumbing (NCHW spec input -> lane-dense blocks).
        x_k = jnp.transpose(x.reshape(B, C, HW), (0, 2, 1))   # (B, HW, C)
        kernel = _se_kernel_channels_last
        blk = (tb, HW, C)
    else:
        x_k = x.reshape(B, C, HW)
        kernel = _se_kernel_channels_first
        blk = (tb, C, HW)

    vmem_limit = int(min(max(4 * tb * padded_image_bytes + 2 * weight_bytes
                             + (4 << 20), 16 << 20), vmem_cap))

    cost = pl.CostEstimate(
        flops=2 * B * C * HW + 4 * B * C * hidden,    # pool + scale + tiny MLP
        transcendentals=B * C,                        # sigmoid
        bytes_accessed=2 * B * C * HW * dtype_bytes,  # read x once, write once
    )

    # Aliasing x -> out is free when x_k is a fresh intermediate (channels-last
    # transpose) and caller-opt-in otherwise.
    io_aliases = {0: 0} if (donate_x or channels_last) else {}

    out = pl.pallas_call(
        kernel,
        out_shape=jax.ShapeDtypeStruct(x_k.shape, x.dtype),
        grid_spec=pltpu.PrefetchScalarGridSpec(
            num_scalar_prefetch=0,
            grid=grid,
            in_specs=[
                pl.BlockSpec(blk, lambda b: (b, 0, 0)),
                pl.BlockSpec((C, hidden), lambda b: (0, 0)),
                pl.BlockSpec((1, hidden), lambda b: (0, 0)),
                pl.BlockSpec((hidden, C), lambda b: (0, 0)),
                pl.BlockSpec((1, C), lambda b: (0, 0)),
            ],
            out_specs=pl.BlockSpec(blk, lambda b: (b, 0, 0)),
        ),
        compiler_params=pltpu.CompilerParams(
            dimension_semantics=("parallel",),
            vmem_limit_bytes=vmem_limit,
        ),
        cost_estimate=cost,
        input_output_aliases=io_aliases,
    )(x_k, w1t, b1_2d, w2t, b2_2d)

    if channels_last:
        return jnp.transpose(out, (0, 2, 1)).reshape(B, C, H, W)
    return out.reshape(B, C, H, W)


# ---------------------------------------------------------------------------
# Reference + self-test
# ---------------------------------------------------------------------------

def reference(x, w1, b1, w2, b2):
    pooled = jnp.mean(x.astype(jnp.float32), axis=(2, 3))               # (B, C)
    h = jnp.maximum(
        jnp.dot(pooled, w1.T, precision=jax.lax.Precision.HIGHEST) + b1, 0.0)
    y = jax.nn.sigmoid(
        jnp.dot(h, w2.T, precision=jax.lax.Precision.HIGHEST) + b2)
    return x * y[:, :, None, None].astype(x.dtype)


if __name__ == "__main__":
    def make_params(key, C, reduction):
        hidden = max(1, C // reduction)
        k1, k2, k3, k4 = jax.random.split(key, 4)
        bound1 = 1.0 / (C ** 0.5)
        w1 = jax.random.uniform(k1, (hidden, C), jnp.float32, -bound1, bound1)
        b1 = jax.random.uniform(k2, (hidden,), jnp.float32, -bound1, bound1)
        bound2 = 1.0 / (hidden ** 0.5)
        w2 = jax.random.uniform(k3, (C, hidden), jnp.float32, -bound2, bound2)
        b2 = jax.random.uniform(k4, (C,), jnp.float32, -bound2, bound2)
        return w1, b1, w2, b2

    root = jax.random.PRNGKey(0)
    tests = [
        # (B, C, H, W, reduction, kwargs)
        (2, 32, 16, 16, 16, {}),                           # channels-first single pass
        (3, 128, 7, 7, 16, {}),                            # channels-last (HW=49) + ragged batch
        (2, 32, 12, 12, 16, {"spatial_split_tile": 128}),  # forced two-pass spatial split
    ]
    for idx, (B, C, H, W, r, kwargs) in enumerate(tests):
        kx, kp = jax.random.split(jax.random.fold_in(root, idx))
        x = jax.random.normal(kx, (B, C, H, W), dtype=jnp.float32)
        w1, b1, w2, b2 = make_params(kp, C, r)
        out = jax.block_until_ready(
            channel_attention(x, w1, b1, w2, b2, **kwargs))
        ref = jax.block_until_ready(reference(x, w1, b1, w2, b2))
        assert out.shape == x.shape, f"shape mismatch in test {idx}"
        assert jnp.allclose(out, ref, atol=1e-4, rtol=1e-4), (
            f"value mismatch vs reference in test {idx}")
    print("KERNEL_OK")
</pallas_src>

<mosaic_0001>
module attributes {stable_mosaic.version = 11 : i64} {
  func.func @_se_kernel_channels_first(%arg0: i32, %arg1: memref<1x32x256xf32, #tpu.memory_space<vmem>>, %arg2: memref<32x2xf32, #tpu.memory_space<vmem>>, %arg3: memref<1x2xf32, #tpu.memory_space<vmem>>, %arg4: memref<2x32xf32, #tpu.memory_space<vmem>>, %arg5: memref<1x32xf32, #tpu.memory_space<vmem>>, %arg6: memref<1x32x256xf32, #tpu.memory_space<vmem>>) attributes {dimension_semantics = [#tpu.dimension_semantics<parallel>], iteration_bounds = array<i64: 2>, scalar_prefetch = 0 : i64, scratch_operands = 0 : i64, tpu.core_type = #tpu.core_type<tc>, window_params = [{transform_indices = @transform_0, window_bounds = array<i64: 1, 32, 256>}, {pipeline_mode = #tpu.pipeline_mode<synchronous>, transform_indices = @transform_1, window_bounds = array<i64: 32, 2>}, {pipeline_mode = #tpu.pipeline_mode<synchronous>, transform_indices = @transform_2, window_bounds = array<i64: 1, 2>}, {pipeline_mode = #tpu.pipeline_mode<synchronous>, transform_indices = @transform_3, window_bounds = array<i64: 2, 32>}, {pipeline_mode = #tpu.pipeline_mode<synchronous>, transform_indices = @transform_4, window_bounds = array<i64: 1, 32>}, {transform_indices = @transform_5, window_bounds = array<i64: 1, 32, 256>}]} {
    %c0 = arith.constant 0 : index
    %c0_0 = arith.constant 0 : index
    %c0_1 = arith.constant 0 : index
    %0 = vector.load %arg1[%c0, %c0_0, %c0_1] : memref<1x32x256xf32, #tpu.memory_space<vmem>>, vector<1x32x256xf32>
    %cst = arith.constant dense<0.000000e+00> : vector<1x32xf32>
    %1 = vector.multi_reduction <add>, %0, %cst [2] : vector<1x32x256xf32> to vector<1x32xf32>
    %cst_2 = arith.constant 3.906250e-03 : f32
    %2 = vector.broadcast %cst_2 : f32 to vector<1x32xf32>
    %3 = arith.mulf %1, %2 : vector<1x32xf32>
    %c0_3 = arith.constant 0 : index
    %c0_4 = arith.constant 0 : index
    %4 = vector.load %arg2[%c0_3, %c0_4] : memref<32x2xf32, #tpu.memory_space<vmem>>, vector<32x2xf32>
    %cst_5 = arith.constant dense<0.000000e+00> : vector<1x2xf32>
    %5 = tpu.matmul %3, %4, %cst_5 {dimension_numbers = #tpu.dot_dimension_numbers<[1], [0], [0], [1], [0, 0, 1, 1], [], []>} : vector<1x32xf32>, vector<32x2xf32>, vector<1x2xf32> -> vector<1x2xf32>
    %c0_6 = arith.constant 0 : index
    %c0_7 = arith.constant 0 : index
    %6 = vector.load %arg3[%c0_6, %c0_7] : memref<1x2xf32, #tpu.memory_space<vmem>>, vector<1x2xf32>
    %7 = arith.addf %5, %6 : vector<1x2xf32>
    %cst_8 = arith.constant 0.000000e+00 : f32
    %8 = vector.broadcast %cst_8 : f32 to vector<1x2xf32>
    %9 = arith.maximumf %7, %8 : vector<1x2xf32>
    %c0_9 = arith.constant 0 : index
    %c0_10 = arith.constant 0 : index
    %10 = vector.load %arg4[%c0_9, %c0_10] : memref<2x32xf32, #tpu.memory_space<vmem>>, vector<2x32xf32>
    %cst_11 = arith.constant dense<0.000000e+00> : vector<1x32xf32>
    %11 = tpu.matmul %9, %10, %cst_11 {dimension_numbers = #tpu.dot_dimension_numbers<[1], [0], [0], [1], [0, 0, 1, 1], [], []>} : vector<1x2xf32>, vector<2x32xf32>, vector<1x32xf32> -> vector<1x32xf32>
    %c0_12 = arith.constant 0 : index
    %c0_13 = arith.constant 0 : index
    %12 = vector.load %arg5[%c0_12, %c0_13] : memref<1x32xf32, #tpu.memory_space<vmem>>, vector<1x32xf32>
    %13 = arith.addf %11, %12 : vector<1x32xf32>
    %14 = arith.negf %13 : vector<1x32xf32>
    %15 = math.exp %14 : vector<1x32xf32>
    %cst_14 = arith.constant 1.000000e+00 : f32
    %16 = vector.broadcast %cst_14 : f32 to vector<1x32xf32>
    %17 = arith.addf %16, %15 : vector<1x32xf32>
    %18 = arith.divf %16, %17 : vector<1x32xf32>
    %19 = vector.shape_cast %18 : vector<1x32xf32> to vector<1x32x1xf32>
    %20 = vector.broadcast %19 : vector<1x32x1xf32> to vector<1x32x256xf32>
    %21 = arith.mulf %0, %20 : vector<1x32x256xf32>
    %c0_15 = arith.constant 0 : index
    %c0_16 = arith.constant 0 : index
    %c0_17 = arith.constant 0 : index
    %22 = vector.load %arg6[%c0_15, %c0_16, %c0_17] : memref<1x32x256xf32, #tpu.memory_space<vmem>>, vector<1x32x256xf32>
    tpu.vector_store %arg6[%c0_15, %c0_16, %c0_17], %21 {strides = array<i32>} : memref<1x32x256xf32, #tpu.memory_space<vmem>>, vector<1x32x256xf32>,
    return
  }
  func.func @transform_0(%arg0: i32) -> (i32, i32, i32) {
    %c0_i32 = arith.constant 0 : i32
    %c0_i32_0 = arith.constant 0 : i32
    %c0_i32_1 = arith.constant 0 : i32
    return %arg0, %c0_i32, %c0_i32_0 : i32, i32, i32
  }
  func.func @transform_1(%arg0: i32) -> (i32, i32) {
    %c0_i32 = arith.constant 0 : i32
    %c0_i32_0 = arith.constant 0 : i32
    %c0_i32_1 = arith.constant 0 : i32
    return %c0_i32, %c0_i32_0 : i32, i32
  }
  func.func @transform_2(%arg0: i32) -> (i32, i32) {
    %c0_i32 = arith.constant 0 : i32
    %c0_i32_0 = arith.constant 0 : i32
    %c0_i32_1 = arith.constant 0 : i32
    return %c0_i32, %c0_i32_0 : i32, i32
  }
  func.func @transform_3(%arg0: i32) -> (i32, i32) {
    %c0_i32 = arith.constant 0 : i32
    %c0_i32_0 = arith.constant 0 : i32
    %c0_i32_1 = arith.constant 0 : i32
    return %c0_i32, %c0_i32_0 : i32, i32
  }
  func.func @transform_4(%arg0: i32) -> (i32, i32) {
    %c0_i32 = arith.constant 0 : i32
    %c0_i32_0 = arith.constant 0 : i32
    %c0_i32_1 = arith.constant 0 : i32
    return %c0_i32, %c0_i32_0 : i32, i32
  }
  func.func @transform_5(%arg0: i32) -> (i32, i32, i32) {
    %c0_i32 = arith.constant 0 : i32
    %c0_i32_0 = arith.constant 0 : i32
    %c0_i32_1 = arith.constant 0 : i32
    return %arg0, %c0_i32, %c0_i32_0 : i32, i32, i32
  }
}

</mosaic_0001>

<bundles_post_ra>
// kernel: channel_attention.1
= control target key start
LH: loop header
LB: loop body
LE: loop exit
PB: predicated region body
PF: predicated region fallthrough
CT: control target
= control target key end

     0   :  { %s514_s18 = smov 0   ;;  %s591_s0 = inlined_call_operand.vmem [shape: f32[2,32,256], index: 0, kind: input, shape index: {}]   ;;  %s592_s1 = inlined_call_operand.vmem [shape: f32[32,2], index: 1, kind: input, shape index: {}]   ;;  %s593_s2 = inlined_call_operand.vmem [shape: f32[1,2], index: 2, kind: input, shape index: {}]   ;;  %s594_s3 = inlined_call_operand.vmem [shape: f32[2,32], index: 3, kind: input, shape index: {}]   ;;  %s595_s4 = inlined_call_operand.vmem [shape: f32[1,32], index: 4, kind: input, shape index: {}]   ;;  %s596_s5 = inlined_call_operand.vmem [shape: f32[2,32,256], index: 5, kind: output, shape index: {}]  }
   0x1 LB: > { %s442_s19 = sadd.s32 4294967295, %s482_s18   ;;  %p446_p0 = scmp.ge.s32.totalorder %s482_s18, 1  ;;  %s482_s18 = sphi %s514_s18, %s15_s18  }
   0x2   : > { %p187_p1 = scmp.lt.s32.totalorder %s482_s18, 3 }
   0x4   : > { %p188_p2 = pnand %p446_p0, %p187_p1 }
   0x5   : > { %p215_p3 = scmp.lt.s32.totalorder (!%p188_p2), %s442_s19, 1 }
   0x6   : > { %191 = sbr.rel (%p188_p2) target bundleno = 557 (0x22d), region = 40 }
   0xb   : > { %s598_s19 = smov (!%p215_p3, %s442_s19), 1  ;;  %v252_v12 = vld [vmem:[%s592_s1 + $0x18] sm:$0xff]  ;;  %v251_v13 = vld [vmem:[%s592_s1 + $0x10] sm:$0xff]  ;;  %v250_v14 = vld [vmem:[%s592_s1 + $0x8] sm:$0xff]  ;;  %v258_v16 = vlaneseq  ;;  %vm263_vm0 = vcmask 130112   ;;  %vm267_vm1 = vcmask 195712  }
   0xc   : > { %s457_s20 = sshll.u32 %s598_s19, 6  ;;  %288 = vmatpush.msra.mxu0 %v252_v12  ;;  %v249_v15 = vld [vmem:[%s592_s1] sm:$0xff]  ;;  %vm271_vm2 = vcmask 261312   ;;  %vm273_vm3 = vcmask 261120   ;;  %vm303_vm4 = vcmask 1041408   ;;  %vm299_vm5 = vcmask 15360  }
   0xd   : > { %s219_s23 = scalar_lea.vmem %s591_s0, %s457_s20  ;;  %v259_v19 = vand.u32 127, %v258_v16  ;;  %v297_v36 = vld [vmem:[%s594_s3] sm:$0x3]  ;;  %v348_v41 = vshrl.u32 %v258_v16, 7  ;;  %s224_s15 = scalar_lea.vmem %s596_s5, %s457_s20 }
   0xe   : > { %v530_v0 = vld [vmem:[%s219_s23] sm:$0xff]  ;;  %v532_v1 = vld [vmem:[%s219_s23 + $0x8] sm:$0xff]  ;;  %v542_v6 = vld [vmem:[%s219_s23 + $0x10] sm:$0xff]  ;;  %289 = vmatpush.msra.mxu0 %v251_v13  ;;  %452 = vmatpush.msk.msra.mxu1 %vm303_vm4, %v297_v36 }
   0xf   : > { %v534_v2 = vld [vmem:[%s219_s23 + $0x20] sm:$0xff]  ;;  %v233_v3 = vadd.f32 %v532_v1, %v530_v0  ;;  %v538_v4 = vld [vmem:[%s219_s23 + $0x28] sm:$0xff]  ;;  %v544_v7 = vld [vmem:[%s219_s23 + $0x18] sm:$0xff]  ;;  %v261_v21 = vadd.s32 4294967288, %v259_v19  ;;  %v265_v22 = vadd.s32 4294967280, %v259_v19  ;;  %v269_v25 = vadd.s32 4294967272, %v259_v19  ;;  %467 = vset.pattern.permute.xlu2 %v348_v41 }
  0x10   : > { %v239_v5 = vadd.f32 %v538_v4, %v534_v2  ;;  %v546_v8 = vld [vmem:[%s219_s23 + $0x30] sm:$0xff]  ;;  %v548_v9 = vld [vmem:[%s219_s23 + $0x38] sm:$0xff]  ;;  %v236_v10 = vadd.f32 %v544_v7, %v542_v6  ;;  %290 = vmatpush.msra.mxu0 %v250_v14  ;;  %v253_v37 = vld [vmem:[%s593_s2] sm:$0x1]  ;;  %v367_v42 = vadd.s32 24, %v348_v41  ;;  %v361_v43 = vadd.s32 16, %v348_v41 }
  0x11   : > { %234 = vadd.xlane.f32.xlu0 %v233_v3  ;;  %v242_v11 = vadd.f32 %v548_v9, %v546_v8  ;;  %v298_v44 = vld [vmem:[%s595_s4] sm:$0x1]  ;;  %v355_v61 = vadd.s32 8, %v348_v41 }
  0x12   : > { %240 = vadd.xlane.f32.xlu1 %v239_v5  ;;  %291 = vmatpush.msra.mxu0 %v249_v15 }
  0x13   : > { %470 = vset.pattern.permute.xlu1 %v367_v42  ;;  %469 = vset.pattern.permute.xlu0 %v361_v43 }
  0x19   : > { %237 = vadd.xlane.f32.xlu0 %v236_v10 }
  0x1a   : > { %243 = vadd.xlane.f32.xlu1 %v242_v11 }
  0x84   : > { %v235_v17 = vpop.xlane.xlu0 %234 }
  0x85   : > { %v241_v18 = vpop.xlane.xlu1 %240  ;;  %v245_v20 = vmul.f32 0.00390625, %v235_v17 }
  0x86   : > { %v247_v23 = vmul.f32 0.00390625, %v241_v18 }
  0x87   : > { %v260_v29 = vperm.slane %v245_v20, %v259_v19 }
  0x88   : > { %v266_v31 = vperm.slane %v247_v23, %v265_v22 }
  0x8c   : > { %v238_v24 = vpop.xlane.xlu0 %237 }
  0x8d   : > { %v246_v26 = vmul.f32 0.00390625, %v238_v24  ;;  %v244_v27 = vpop.xlane.xlu1 %243 }
  0x8e   : > { %v248_v28 = vmul.f32 0.00390625, %v244_v27 }
  0x8f   : > { %v262_v30 = vperm.slane %v246_v26, %v261_v21 }
  0x90   : > { %v270_v32 = vperm.slane %v248_v28, %v269_v25 }
  0x91   : > { %v264_v33 = vsel %vm263_vm0, %v262_v30, %v260_v29 }
  0x92   : > { %v268_v34 = vsel %vm267_vm1, %v266_v31, %v264_v33 }
  0x93   : > { %v272_v35 = vsel %vm271_vm2, %v270_v32, %v268_v34 }
  0x94   : > { %451 = vmatmul.msk.f32.vlgmr.msra.gmra.mxu0 %vm273_vm3, %v272_v35 }
 0x111   : > { %v293_v38 = vpop.f32.mrf.mxu0 }
 0x112   : > { %v294_v39 = vadd.f32 %v293_v38, %v253_v37 }
 0x114   : > { %v296_v40 = vmax.f32 %v294_v39, 0.0 }
 0x116   : > { %453 = vmatmul.msk.f32.vlgmr.msra.gmra.mxu1 %vm299_vm5, %v296_v40 }
 0x193   : > { %v324_v45 = vpop.f32.mrf.mxu1 }
 0x194   : > { %v325_v46 = vadd.f32 %v324_v45, %v298_v44 }
 0x196   : > { %v454_v47 = vmul.f32 -1.442695, %v325_v46 }
 0x198   : > { %472 = vpow2.f32 %v454_v47 }
 0x19e   : > { %v473_v48 = vpop.eup %472 }
 0x19f   : > { %v330_v49 = vadd.f32 1.0, %v473_v48 }
 0x1a1   : > { %474 = vrcp.f32 %v330_v49  ;;  %v342_v53 = vand.u32 2147483648, %v330_v49  ;;  %v340_v55 = vand.u32 2147483647, %v330_v49  ;;  %vm336_vm7 = vweird.f32 %v330_v49 }
 0x1a3   : > { %v343_v57 = vor.u32 1.1754944e-38, %v342_v53  ;;  %vm341_vm9 = vcmp.eq.f32.partialorder %v340_v55, 8.507059e+37 }
 0x1a7   : > { %v475_v50 = vpop.eup %474 }
 0x1a8   : > { %v332_v51 = vmul.f32 %v475_v50, %v330_v49  ;;  %vm337_vm6 = vweird.f32 %v475_v50 }
 0x1a9   : > { %vm338_vm8 = vmor %vm336_vm7, %vm337_vm6 }
 0x1aa   : > { %v333_v52 = vsub.f32 1.0, %v332_v51 }
 0x1ac   : > { %v334_v54 = vmul.f32 %v475_v50, %v333_v52 }
 0x1ae   : > { %v335_v56 = vadd.f32 %v475_v50, %v334_v54 }
 0x1b0   : > { %v339_v58 = vsel %vm338_vm8, %v475_v50, %v335_v56 }
 0x1b1   : > { %v344_v59 = vsel %vm341_vm9, %v343_v57, %v339_v58 }
 0x1b2   : > { %v346_v60 = vperm.slane %v344_v59, 0 }
 0x1b4   : > { %369 = vperm.xlu1 %470, %v346_v60   ;;  %363 = vperm.xlu0 %469, %v346_v60  }
 0x1b5   : > { %351 = vperm.xlu2 %467, %v346_v60  }
 0x1bc   : > { %471 = vset.pattern.permute.xlu0 %v367_v42 }
 0x1bd   : > { %468 = vset.pattern.permute.xlu2 %v355_v61 }
 0x1c5   : > { %357 = vperm.xlu2 %468, %v346_v60  }
 0x20f   : > { %v352_v62 = vpop.permute.xlu2 %351 }
 0x210   : > { %v371_v63 = vmul.f32 %v352_v62, %v530_v0  ;;  %v372_v3 = vmul.f32 %v352_v62, %v532_v1 }
 0x212   : > { %379 = vst [vmem:[%s224_s15] sm:$0xff] %v371_v63 }
 0x213   : > { %380 = vst [vmem:[%s224_s15 + $0x8] sm:$0xff] %v372_v3 }
 0x21f   : > { %v358_v5 = vpop.permute.xlu2 %357 }
 0x220   : > { %v373_v10 = vmul.f32 %v358_v5, %v542_v6  ;;  %v374_v11 = vmul.f32 %v358_v5, %v544_v7 }
 0x222   : > { %381 = vst [vmem:[%s224_s15 + $0x10] sm:$0xff] %v373_v10 }
 0x223   : > { %382 = vst [vmem:[%s224_s15 + $0x18] sm:$0xff] %v374_v11 }
 0x226   : > { %v370_v12 = vpop.permute.xlu1 %369  ;;  %v364_v13 = vpop.permute.xlu0 %363 }
 0x227   : > { %v377_v14 = vmul.f32 %v370_v12, %v546_v8  ;;  %v378_v15 = vmul.f32 %v370_v12, %v548_v9  ;;  %v375_v16 = vmul.f32 %v364_v13, %v534_v2  ;;  %v376_v0 = vmul.f32 %v364_v13, %v538_v4 }
 0x229   : > { %385 = vst [vmem:[%s224_s15 + $0x30] sm:$0xff] %v377_v14 }
 0x22a   : > { %386 = vst [vmem:[%s224_s15 + $0x38] sm:$0xff] %v378_v15 }
 0x22b   : > { %383 = vst [vmem:[%s224_s15 + $0x20] sm:$0xff] %v375_v16 }
 0x22c   : > { %384 = vst [vmem:[%s224_s15 + $0x28] sm:$0xff] %v376_v0 }
 0x22d PF: > { %s15_s18 = sadd.s32 1, %s482_s18  }
 0x22e   : > { %p12_p4 = scmp.ge.s32.totalorder %s15_s18, 4  }
 0x230   :  { %14 = sbr.rel (!%p12_p4) target bundleno = 1 (0x1), region = 70 }

</bundles_post_ra>
